<compile_context>
chip_gen: v5e
topology: v5e:2x2
jax: 0.10.0
libtpu: 0.0.40
codegen_flags: <defaults>
</compile_context>

<pallas_src>
import functools

import jax
import jax.numpy as jnp
from jax.experimental import pallas as pl
from jax.experimental.pallas import tpu as pltpu

_MIB = 1024 * 1024


def _cdiv(a, b):
    return -(-a // b)


def _round_up(a, m):
    return _cdiv(a, m) * m


def _round_down(a, m):
    return max(m, (a // m) * m)


def _physical_vmem_bytes():
    """Best-effort physical VMEM per TensorCore; conservative fallback."""
    try:
        info = pltpu.get_tpu_info()
        v = int(getattr(info, "vmem_capacity_bytes", 0) or 0)
        if v > 0:
            return v
    except Exception:
        pass
    return 64 * _MIB  # v7x per-TC size; safe lower bound for v5e/v6e too.


def _linear_decoder_kernel(z_ref, w_ref, b_ref, o_ref, acc_ref):
    # z_ref: (tm, tk)  w_ref: (tk, tn)  b_ref: (1, tn)
    # o_ref: (tm, tn)  acc_ref: (tm, tn) f32 scratch
    k = pl.program_id(2)

    @pl.when(k == 0)
    def _():
        acc_ref[...] = jnp.zeros_like(acc_ref)

    acc_ref[...] += jnp.dot(z_ref[...], w_ref[...],
                            preferred_element_type=jnp.float32)

    @pl.when(k == pl.num_programs(2) - 1)
    def _():
        o_ref[...] = (acc_ref[...] + b_ref[...].astype(jnp.float32)
                      ).astype(o_ref.dtype)


def _pick_tiles(B, Z, D, z_it, w_it, b_it, o_it, budget):
    """Pick (tm, tn, tk): large, lane/sublane aligned, within `budget` bytes."""
    sub_m = max(8, 32 // z_it)  # sublane multiple for the activation dtype

    def vmem_bytes(tm, tn, tk):
        # double-buffered inputs + output, plus the f32 accumulator scratch
        return (2 * (tm * tk * z_it + tk * tn * w_it + tn * b_it)
                + 2 * tm * tn * o_it
                + tm * tn * 4)

    # Batch tile: full batch if small, else 256 (fills MXU rows).
    tm = B if B <= 256 else 256
    if tm < B:
        tm = _round_down(tm, sub_m)

    # Output tile: scale with Z so each W^T tile DMA is ~3 MiB (lane aligned).
    tn = max(512, ((3 * _MIB) // max(Z * w_it, 1)) // 128 * 128)
    if tn >= D:
        tn = D
    # Keep >= 2 D-steps when the batch fits a single tile: feeds both v7x TCs
    # and gives the pipeline a next weight tile to prefetch on every chip.
    if B <= tm and tn >= D and D >= 512:
        tn = _round_up(_cdiv(D, 2), 128)

    # K tile: full Z unless the working set blows the budget. Halve only while
    # the result still divides Z exactly and stays a multiple of 128 (>= 512),
    # so partial K tiles (garbage in the reduction) never occur.
    tk = Z
    while (vmem_bytes(tm, tn, tk) > budget and tk % 2 == 0
           and (tk // 2) % 128 == 0 and tk // 2 >= 512):
        tk //= 2
    # Then shrink tm (MXU rows are already underfilled for thin batches)...
    while vmem_bytes(tm, tn, tk) > budget and tm > sub_m:
        tm = _round_down(tm // 2, sub_m)
    # ... and only then tn (keep output stores lane-dense; floor 256 then 128).
    while vmem_bytes(tm, tn, tk) > budget and tn > 256:
        tn = max(256, _round_down(tn // 2, 128))
    while vmem_bytes(tm, tn, tk) > budget and tn > 128:
        tn = _round_down(tn // 2, 128)

    return tm, tn, tk, vmem_bytes(tm, tn, tk)


def prepare_linear_decoder_params(weight, bias):
    """Hoist layout work out of the per-call path.

    weight: (D, Z) in PyTorch nn.Linear layout; bias: (D,).
    Returns (w_t, b2d) with w_t: (Z, D) (lane-dense on D), b2d: (1, D).
    """
    D, Z = weight.shape
    assert bias.shape == (D,)
    w_t = jnp.asarray(weight).T
    b2d = jnp.asarray(bias).reshape(1, D)
    return w_t, b2d


@functools.partial(jax.jit, static_argnames=("force_pallas", "vmem_budget_bytes"))
def linear_decoder_apply(z, w_t, b2d, *, force_pallas=False,
                         vmem_budget_bytes=None):
    """z: (B, Z); w_t: (Z, D); b2d: (1, D). Returns z @ w_t + b2d."""
    B, Z = z.shape
    Zw, D = w_t.shape
    assert Zw == Z and b2d.shape == (1, D)

    z_it = jnp.dtype(z.dtype).itemsize
    w_it = jnp.dtype(w_t.dtype).itemsize
    b_it = jnp.dtype(b2d.dtype).itemsize
    out_dtype = z.dtype
    o_it = jnp.dtype(out_dtype).itemsize

    # Tiny problems: pallas_call dispatch overhead dominates; let XLA fuse it.
    single_pass_bytes = B * Z * z_it + Z * D * w_it + D * b_it + B * D * o_it
    if not force_pallas and single_pass_bytes < 256 * 1024:
        acc = jnp.dot(z, w_t, preferred_element_type=jnp.float32)
        return (acc + b2d.astype(jnp.float32)).astype(out_dtype)

    phys_vmem = _physical_vmem_bytes()
    budget = (vmem_budget_bytes if vmem_budget_bytes is not None
              else min(96 * _MIB, phys_vmem // 2))

    tm, tn, tk, working = _pick_tiles(B, Z, D, z_it, w_it, b_it, o_it, budget)
    ni, nj, nk = _cdiv(B, tm), _cdiv(D, tn), _cdiv(Z, tk)

    # Grid order: keep whichever operand is cheaper to re-stream resident
    # across the inner sweep (matters when nk == 1; with nk > 1 both stream).
    restream_ji = (nj - 1) * B * Z * z_it   # z re-fetched once per extra D tile
    restream_ij = (ni - 1) * Z * D * w_it   # W re-fetched once per extra B tile
    order_ji = restream_ji <= restream_ij

    if order_ji:   # grid = (D tiles, B tiles, K tiles); W/bias resident over i
        grid = (nj, ni, nk)
        z_spec = pl.BlockSpec((tm, tk), lambda j, i, k: (i, k))
        w_spec = pl.BlockSpec((tk, tn), lambda j, i, k: (k, j))
        b_spec = pl.BlockSpec((1, tn), lambda j, i, k: (0, j))
        o_spec = pl.BlockSpec((tm, tn), lambda j, i, k: (i, j))
    else:          # grid = (B tiles, D tiles, K tiles); z resident over j
        grid = (ni, nj, nk)
        z_spec = pl.BlockSpec((tm, tk), lambda i, j, k: (i, k))
        w_spec = pl.BlockSpec((tk, tn), lambda i, j, k: (k, j))
        b_spec = pl.BlockSpec((1, tn), lambda i, j, k: (0, j))
        o_spec = pl.BlockSpec((tm, tn), lambda i, j, k: (i, j))

    # Advisory cost: actual streamed bytes for the chosen order.
    if nk == 1:
        z_passes, w_passes = (nj, 1) if order_ji else (1, ni)
    else:
        z_passes, w_passes = nj, ni
    cost = pl.CostEstimate(
        flops=2 * B * Z * D,
        transcendentals=0,
        bytes_accessed=(z_passes * B * Z * z_it + w_passes * Z * D * w_it
                        + D * b_it + B * D * o_it),
    )

    # Explicit scoped-VMEM limit: working set + headroom (never below 32 MiB,
    # never above ~90% of physical VMEM).
    vmem_limit = int(min(phys_vmem * 9 // 10,
                         max(working + 8 * _MIB, 32 * _MIB)))

    return pl.pallas_call(
        _linear_decoder_kernel,
        out_shape=jax.ShapeDtypeStruct((B, D), out_dtype),
        grid_spec=pltpu.PrefetchScalarGridSpec(
            num_scalar_prefetch=0,
            grid=grid,
            in_specs=[z_spec, w_spec, b_spec],
            out_specs=o_spec,
            scratch_shapes=[pltpu.VMEM((tm, tn), jnp.float32)],
        ),
        compiler_params=pltpu.CompilerParams(
            dimension_semantics=("parallel", "parallel", "arbitrary"),
            vmem_limit_bytes=vmem_limit,
        ),
        cost_estimate=cost,
    )(z, w_t, b2d)


def linear_decoder(z, weight, bias):
    """One-shot API matching nn.Linear(latent_dim, output_dim).forward.

    For repeated calls, use prepare_linear_decoder_params once and call
    linear_decoder_apply to avoid re-transposing the weight every invocation.
    """
    w_t, b2d = prepare_linear_decoder_params(weight, bias)
    return linear_decoder_apply(z, w_t, b2d)


def _make_params(kz, kw, kb, B, Z, D):
    bound = 1.0 / (Z ** 0.5)
    weight = jax.random.uniform(kw, (D, Z), jnp.float32, minval=-bound, maxval=bound)
    bias = jax.random.uniform(kb, (D,), jnp.float32, minval=-bound, maxval=bound)
    z = jax.random.normal(kz, (B, Z), jnp.float32)
    return z, weight, bias


if __name__ == "__main__":
    key = jax.random.PRNGKey(0)
    keys = jax.random.split(key, 9)
    hi = jax.lax.Precision.HIGHEST

    # --- Test 1: module-scale shapes (batch=8, latent_dim=32, output_dim=256)
    # forced through the Pallas kernel (auto-dispatch would use the tiny path).
    B, Z, D = 8, 32, 256
    z1, w1, b1 = _make_params(keys[0], keys[1], keys[2], B, Z, D)
    wt1, bb1 = prepare_linear_decoder_params(w1, b1)
    out1 = jax.block_until_ready(linear_decoder_apply(z1, wt1, bb1, force_pallas=True))
    ref1 = jnp.dot(z1, w1.T, precision=hi) + b1
    assert out1.shape == (B, D)
    assert jnp.allclose(out1, ref1, atol=1e-5, rtol=1e-5)

    # --- Test 2: tiled path with multiple D tiles (auto dispatch -> Pallas).
    B, Z, D = 256, 64, 1024
    z2, w2, b2 = _make_params(keys[3], keys[4], keys[5], B, Z, D)
    wt2, bb2 = prepare_linear_decoder_params(w2, b2)
    out2 = jax.block_until_ready(linear_decoder_apply(z2, wt2, bb2))
    ref2 = jnp.dot(z2, w2.T, precision=hi) + b2
    assert out2.shape == (B, D)
    assert jnp.allclose(out2, ref2, atol=1e-4, rtol=1e-4)

    # --- Test 3: large-Z case exercising the K-tiled accumulator path
    # (small budget override forces tk < Z).
    B, Z, D = 64, 2048, 512
    z3, w3, b3 = _make_params(keys[6], keys[7], keys[8], B, Z, D)
    wt3, bb3 = prepare_linear_decoder_params(w3, b3)
    out3 = jax.block_until_ready(
        linear_decoder_apply(z3, wt3, bb3, force_pallas=True,
                             vmem_budget_bytes=2 * _MIB))
    ref3 = jnp.dot(z3, w3.T, precision=hi) + b3
    assert out3.shape == (B, D)
    assert jnp.allclose(out3, ref3, atol=1e-4, rtol=1e-4)

    print("KERNEL_OK")
</pallas_src>

<mosaic_0001>
module attributes {stable_mosaic.version = 11 : i64} {
  func.func @_linear_decoder_kernel(%arg0: i32, %arg1: i32, %arg2: i32, %arg3: memref<8x32xf32, #tpu.memory_space<vmem>>, %arg4: memref<32x256xf32, #tpu.memory_space<vmem>>, %arg5: memref<1x256xf32, #tpu.memory_space<vmem>>, %arg6: memref<8x256xf32, #tpu.memory_space<vmem>>, %arg7: memref<8x256xf32, #tpu.memory_space<vmem>>) attributes {dimension_semantics = [#tpu.dimension_semantics<parallel>, #tpu.dimension_semantics<parallel>, #tpu.dimension_semantics<arbitrary>], iteration_bounds = array<i64: 1, 1, 1>, scalar_prefetch = 0 : i64, scratch_operands = 1 : i64, tpu.core_type = #tpu.core_type<tc>, window_params = [{transform_indices = @transform_0, window_bounds = array<i64: 8, 32>}, {transform_indices = @transform_1, window_bounds = array<i64: 32, 256>}, {transform_indices = @transform_2, window_bounds = array<i64: 1, 256>}, {transform_indices = @transform_3, window_bounds = array<i64: 8, 256>}]} {
    %c0_i32 = arith.constant 0 : i32
    %0 = arith.cmpi eq, %arg2, %c0_i32 : i32
    %1 = arith.extui %0 : i1 to i32
    %c0_i32_0 = arith.constant 0 : i32
    %2 = arith.cmpi ne, %1, %c0_i32_0 : i32
    scf.if %2 {
      %cst_10 = arith.constant 0.000000e+00 : f32
      %12 = vector.broadcast %cst_10 : f32 to vector<8x256xf32>
      %c0_11 = arith.constant 0 : index
      %c0_12 = arith.constant 0 : index
      %13 = vector.load %arg7[%c0_11, %c0_12] : memref<8x256xf32, #tpu.memory_space<vmem>>, vector<8x256xf32>
      tpu.vector_store %arg7[%c0_11, %c0_12], %12 {strides = array<i32>} : memref<8x256xf32, #tpu.memory_space<vmem>>, vector<8x256xf32>,
    } else {
    }
    %c0 = arith.constant 0 : index
    %c0_1 = arith.constant 0 : index
    %3 = vector.load %arg7[%c0, %c0_1] : memref<8x256xf32, #tpu.memory_space<vmem>>, vector<8x256xf32>
    %c0_2 = arith.constant 0 : index
    %c0_3 = arith.constant 0 : index
    %4 = vector.load %arg3[%c0_2, %c0_3] : memref<8x32xf32, #tpu.memory_space<vmem>>, vector<8x32xf32>
    %c0_4 = arith.constant 0 : index
    %c0_5 = arith.constant 0 : index
    %5 = vector.load %arg4[%c0_4, %c0_5] : memref<32x256xf32, #tpu.memory_space<vmem>>, vector<32x256xf32>
    %cst = arith.constant dense<0.000000e+00> : vector<8x256xf32>
    %6 = tpu.matmul %4, %5, %cst {dimension_numbers = #tpu.dot_dimension_numbers<[1], [0], [0], [1], [0, 0, 1, 1], [], []>} : vector<8x32xf32>, vector<32x256xf32>, vector<8x256xf32> -> vector<8x256xf32>
    %7 = arith.addf %3, %6 : vector<8x256xf32>
    %c0_6 = arith.constant 0 : index
    %c0_7 = arith.constant 0 : index
    %8 = vector.load %arg7[%c0_6, %c0_7] : memref<8x256xf32, #tpu.memory_space<vmem>>, vector<8x256xf32>
    tpu.vector_store %arg7[%c0_6, %c0_7], %7 {strides = array<i32>} : memref<8x256xf32, #tpu.memory_space<vmem>>, vector<8x256xf32>,
    %c0_i32_8 = arith.constant 0 : i32
    %9 = arith.cmpi eq, %arg2, %c0_i32_8 : i32
    %10 = arith.extui %9 : i1 to i32
    %c0_i32_9 = arith.constant 0 : i32
    %11 = arith.cmpi ne, %10, %c0_i32_9 : i32
    scf.if %11 {
      %c0_10 = arith.constant 0 : index
      %c0_11 = arith.constant 0 : index
      %12 = vector.load %arg7[%c0_10, %c0_11] : memref<8x256xf32, #tpu.memory_space<vmem>>, vector<8x256xf32>
      %c0_12 = arith.constant 0 : index
      %c0_13 = arith.constant 0 : index
      %13 = vector.load %arg5[%c0_12, %c0_13] : memref<1x256xf32, #tpu.memory_space<vmem>>, vector<1x256xf32>
      %14 = vector.broadcast %13 : vector<1x256xf32> to vector<8x256xf32>
      %15 = arith.addf %12, %14 : vector<8x256xf32>
      %c0_14 = arith.constant 0 : index
      %c0_15 = arith.constant 0 : index
      %16 = vector.load %arg6[%c0_14, %c0_15] : memref<8x256xf32, #tpu.memory_space<vmem>>, vector<8x256xf32>
      tpu.vector_store %arg6[%c0_14, %c0_15], %15 {strides = array<i32>} : memref<8x256xf32, #tpu.memory_space<vmem>>, vector<8x256xf32>,
    } else {
    }
    return
  }
  func.func @transform_0(%arg0: i32, %arg1: i32, %arg2: i32) -> (i32, i32) {
    %c0_i32 = arith.constant 0 : i32
    return %arg1, %arg2 : i32, i32
  }
  func.func @transform_1(%arg0: i32, %arg1: i32, %arg2: i32) -> (i32, i32) {
    %c0_i32 = arith.constant 0 : i32
    return %arg2, %arg0 : i32, i32
  }
  func.func @transform_2(%arg0: i32, %arg1: i32, %arg2: i32) -> (i32, i32) {
    %c0_i32 = arith.constant 0 : i32
    %c0_i32_0 = arith.constant 0 : i32
    return %c0_i32, %arg0 : i32, i32
  }
  func.func @transform_3(%arg0: i32, %arg1: i32, %arg2: i32) -> (i32, i32) {
    %c0_i32 = arith.constant 0 : i32
    return %arg1, %arg0 : i32, i32
  }
}

</mosaic_0001>

<bundles_post_ra>
// kernel: linear_decoder_apply.1
= control target key start
LH: loop header
LB: loop body
LE: loop exit
PB: predicated region body
PF: predicated region fallthrough
CT: control target
= control target key end

     0   :  { %8 = vsyncpa [#allocation4], 0  ;;  %s304_s0 = inlined_call_operand.hbm [shape: f32[8,32], index: 0, kind: input, shape index: {}]   ;;  %s305_s1 = inlined_call_operand.hbm [shape: f32[32,256], index: 1, kind: input, shape index: {}]   ;;  %s306_s2 = inlined_call_operand.hbm [shape: f32[1,256], index: 2, kind: input, shape index: {}]   ;;  %s307_s3 = inlined_call_operand.hbm [shape: f32[8,256], index: 3, kind: output, shape index: {}]  }
   0x1   :  { %9 = vsyncpa [#allocation7], 0  ;;  %s26_s14 = sshll.u32 %s305_s1, 4  ;;  %s27_s14 = int_to_ptr.hbm [resolvable:$true] %s26_s14 }
   0x2   :  { %10 = vsyncpa [#allocation5], 0  ;;  %s266_s15 = smov [#allocation6]   ;;  %s16_s19 = sshll.u32 %s304_s0, 4  ;;  %s17_s19 = int_to_ptr.hbm [resolvable:$true] %s16_s19 }
   0x3   :  { %s28_s16 = sshll.u32 %s266_s15, 4  ;;  %s267_s20 = smov 256   ;;  %s29_s16 = int_to_ptr.vmem [resolvable:$true] %s28_s16 }
   0x4   :  { %s268_s21 = smov 16   ;;  %s269_s22 = smov [#allocation3]  }
   0x5   :  { %34 = dma.hbm_to_vmem [thread:$0]  %s27_s14, 1024, %s29_s16, [#allocation7], %s267_s20, %s267_s20, %s268_s21  }
   0x6   :  { %s18_s23 = sshll.u32 %s269_s22, 4  ;;  %s40_s26 = sshll.u32 %s306_s2, 4  ;;  %s19_s23 = int_to_ptr.vmem [resolvable:$true] %s18_s23  ;;  %s41_s26 = int_to_ptr.hbm [resolvable:$true] %s40_s26 }
   0x7   :  { %21 = dma.hbm_to_vmem [thread:$0]  %s17_s19, 128, %s19_s23, [#allocation4]  }
   0x8   :  { %s270_s1 = smov [#allocation8]  }
   0x9   :  { %s42_s27 = sshll.u32 %s270_s1, 4  ;;  %s43_s27 = int_to_ptr.vmem [resolvable:$true] %s42_s27 }
   0xa   :  { %45 = dma.hbm_to_vmem [thread:$0]  %s41_s26, 32, %s43_s27, [#allocation7]  }
   0xb   :  { %260 = dma.done.wait [#allocation4], 128  }
   0xc   :  { %261 = vsyncadd [#allocation4], 4294967168 }
   0xd   :  { %262 = dma.done.wait [#allocation7], 1056  }
   0xe   :  { %263 = vsyncadd [#allocation7], 4294966240  ;;  %v73_v0 = vld [vmem:[#allocation6 + $0x30] sm:$0xff]  ;;  %v74_v1 = vld [vmem:[#allocation6 + $0x38] sm:$0xff]  ;;  %vm75_vm0 = vcmask 261120   ;;  %s271_s0 = smov [#allocation9]  }
   0xf   :  { %v71_v2 = vld [vmem:[#allocation6 + $0x20] sm:$0xff]  ;;  %91 = vmatpush.msra.mxu0 %v73_v0  ;;  %111 = vmatpush.msra.mxu1 %v74_v1  ;;  %v72_v3 = vld [vmem:[#allocation6 + $0x28] sm:$0xff]  ;;  %v69_v4 = vld [vmem:[#allocation6 + $0x10] sm:$0xff]  ;;  %s143_s2 = sshll.u32 %s271_s0, 4  ;;  %s145_s30 = sshll.u32 %s307_s3, 4  ;;  %s144_s2 = int_to_ptr.vmem [resolvable:$true] %s143_s2  ;;  %s146_s30 = int_to_ptr.hbm [resolvable:$true] %s145_s30 }
  0x10   :  { %v70_v5 = vld [vmem:[#allocation6 + $0x18] sm:$0xff]  ;;  %v67_v6 = vld [vmem:[#allocation6] sm:$0xff]  ;;  %v68_v7 = vld [vmem:[#allocation6 + $0x8] sm:$0xff] }
  0x11   :  { %92 = vmatpush.msra.mxu0 %v71_v2  ;;  %112 = vmatpush.msra.mxu1 %v72_v3  ;;  %v66_v8 = vld [vmem:[#allocation3] sm:$0xff]  ;;  %v128_v9 = vld [vmem:[#allocation8] sm:$0x3] }
  0x12   :  { %v130_v10 = vperm.slane %v128_v9, 0  ;;  %v131_v11 = vperm.slane %v128_v9, 1 }
  0x13   :  { %93 = vmatpush.msra.mxu0 %v69_v4  ;;  %113 = vmatpush.msra.mxu1 %v70_v5 }
  0x15   :  { %94 = vmatpush.msra.mxu0 %v67_v6  ;;  %114 = vmatpush.msra.mxu1 %v68_v7 }
  0x16   :  { %156 = vmatmul.msk.f32.vlgmr.msra.gmra.mxu0 %vm75_vm0, %v66_v8  ;;  %157 = vmatmul.msk.f32.vlgmr.msra.gmra.mxu1 %vm75_vm0, %v66_v8 }
  0x93   :  { %v96_v12 = vpop.f32.mrf.mxu0  ;;  %v116_v13 = vpop.f32.mrf.mxu1 }
  0x94   :  { %v134_v14 = vadd.f32 %v130_v10, %v96_v12  ;;  %v135_v15 = vadd.f32 %v131_v11, %v116_v13 }
  0x96   :  { %136 = vst [vmem:[#allocation9] sm:$0xff] %v134_v14 }
  0x97   :  { %137 = vst [vmem:[#allocation9 + $0x8] sm:$0xff] %v135_v15 }
  0x98   :  { %148 = dma.vmem_to_hbm [thread:$0]  %s144_s2, 256, %s146_s30, [#allocation5]  }
  0x99   :  { %264 = dma.done.wait [#allocation5], 256  }
  0x9a   :  { %265 = vsyncadd [#allocation5], 4294967040 }
  0x9b   :  { %153 = vsyncpa [#allocation4], 1 }
  0x9c   :  { %154 = vsyncpa [#allocation7], 1 }
  0x9d   :  { %155 = vsyncpa [#allocation5], 1 }

</bundles_post_ra>
